<compile_context>
chip_gen: v7x
topology: tpu7x:2x2x1
jax: 0.10.0
libtpu: 0.0.40
codegen_flags: <defaults>
</compile_context>

<pallas_src>
import math

import jax
import jax.numpy as jnp
from jax.experimental import pallas as pl
from jax.experimental.pallas import tpu as pltpu


def _fsda_kernel(x_ref, w1_ref, b1_ref, w2_ref, b2_ref, new_ref):
    # x_ref:  (TR, HW)            rows = flattened (sample, channel)
    # w1_ref: (TPS*HID, TR)       block-diagonal (per-sample) first MLP layer
    # b1_ref: (TPS*HID, 1)
    # w2_ref: (TR, TPS*HID)       block-diagonal second MLP layer
    # b2_ref: (TR, 1)
    xv = x_ref[...].astype(jnp.float32)                       # (TR, HW)

    # --- ExtractModel: global average pool + MLP + sigmoid ----------------
    pooled = jnp.mean(xv, axis=1, keepdims=True)              # (TR, 1)
    # Tiny per-tile MLP.  Width-1 RHS is fine here: it runs once per large
    # tile, so MXU fill/drain latency is amortized over the tile's DMA time.
    h = jnp.dot(w1_ref[...], pooled,
                preferred_element_type=jnp.float32) + b1_ref[...]
    h = jnp.maximum(h, 0.0)                                   # ReLU
    logits = jnp.dot(w2_ref[...], h,
                     preferred_element_type=jnp.float32) + b2_ref[...]
    importance = jax.nn.sigmoid(logits)                       # (TR, 1)

    # --- Emphasize: channel-wise re-weighting ------------------------------
    new_ref[...] = (xv * importance).astype(new_ref.dtype)    # (TR, HW)


def _choose_row_tile(R, C, HW, HID, itemsize):
    """Rows per grid step.

    A tile must hold whole samples (multiple of C) and satisfy the sublane
    rule (multiple of 8, or be the full array).  Two caps:
      * streaming budget: in+out tiles, double-buffered, ~8 MiB total
        (safe under the v5e 16 MiB scoped-VMEM default);
      * block-diagonal MLP weights grow as TPS^2 -- cap them at ~1 MiB.
    Prefer >= 2 grid steps so the v7x megacore gets both TensorCores busy.
    """
    lcm = (C * 8) // math.gcd(C, 8)
    if R % lcm != 0:
        # TODO(synk): pad-to-multiple path for odd N*C; for now one full block.
        return R
    # x tile + new tile, double-buffered -> ~4 * TR * HW * itemsize bytes.
    stream_rows = max(lcm, (8 * 1024 * 1024) // (4 * HW * itemsize))
    # 2 * (TPS*HID) * (TPS*C) * 4 bytes <= 1 MiB  ->  TPS <= sqrt(2^17/(HID*C))
    tps_cap = max(1, math.isqrt((1024 * 1024) // (8 * HID * C)))
    weight_rows = max(lcm, tps_cap * C)
    tr = min(R, stream_rows, weight_rows)
    tr = max(lcm, (tr // lcm) * lcm)
    if R // tr < 2 and R >= 2 * lcm:              # give megacore >= 2 steps
        tr = max(lcm, (R // 2 // lcm) * lcm)
    while R % tr != 0:                            # avoid partial blocks
        tr -= lcm
    return tr


def fsda_forward(x_nchw, w1, b1, w2, b2):
    """x_nchw: (N, C, H, W). Returns new: (N, C, H, W) (same as FSDA.forward)."""
    N, C, H, W = x_nchw.shape
    HW = H * W
    HID = w1.shape[0]
    R = N * C

    # TODO(synk): if HW ever grows beyond what fits one block, switch to the
    # two-phase structure (pool-accumulate pass, then MLP + emphasize pass).
    x2 = x_nchw.reshape(R, HW)                    # layout-only reshape

    TR = _choose_row_tile(R, C, HW, HID, x_nchw.dtype.itemsize)
    TPS = TR // C                                 # samples per tile
    grid = R // TR

    # Per-tile block-diagonal MLP weights (identical for every tile; fetched
    # once since their index_map is constant across the grid).
    eye = jnp.eye(TPS, dtype=w1.dtype)
    w1bd = jnp.kron(eye, w1)                      # (TPS*HID, TR)
    w2bd = jnp.kron(eye, w2)                      # (TR, TPS*HID)
    b1r = jnp.tile(b1, (TPS, 1))                  # (TPS*HID, 1)
    b2r = jnp.tile(b2, (TPS, 1))                  # (TR, 1)

    itemsize = x_nchw.dtype.itemsize
    cost = pl.CostEstimate(
        flops=3 * R * HW + 4 * R * HID,           # pool + reweight + tiny MLP
        transcendentals=R,                        # sigmoid
        bytes_accessed=2 * R * HW * itemsize
        + grid * (w1bd.size + w2bd.size + b1r.size + b2r.size) * itemsize,
    )

    new2 = pl.pallas_call(
        _fsda_kernel,
        out_shape=jax.ShapeDtypeStruct((R, HW), x_nchw.dtype),
        grid_spec=pltpu.PrefetchScalarGridSpec(
            num_scalar_prefetch=0,
            grid=(grid,),
            in_specs=[
                pl.BlockSpec((TR, HW), lambda i: (i, 0)),
                pl.BlockSpec((TPS * HID, TR), lambda i: (0, 0)),
                pl.BlockSpec((TPS * HID, 1), lambda i: (0, 0)),
                pl.BlockSpec((TR, TPS * HID), lambda i: (0, 0)),
                pl.BlockSpec((TR, 1), lambda i: (0, 0)),
            ],
            out_specs=pl.BlockSpec((TR, HW), lambda i: (i, 0)),
        ),
        compiler_params=pltpu.CompilerParams(
            dimension_semantics=("parallel",)),
        cost_estimate=cost,
    )(x2, w1bd, b1r, w2bd, b2r)

    return new2.reshape(N, C, H, W)


if __name__ == "__main__":
    N, C, H, W = 2, 4, 16, 16
    HID = 32

    key = jax.random.PRNGKey(0)
    kx, k1, k2, k3, k4 = jax.random.split(key, 5)

    x = jax.random.normal(kx, (N, C, H, W), dtype=jnp.float32)
    # Deterministic parameter init (ExtractModel MLP weights).
    w1 = jax.random.normal(k1, (HID, C), dtype=jnp.float32) * 0.1
    b1 = jax.random.normal(k2, (HID, 1), dtype=jnp.float32) * 0.01
    w2 = jax.random.normal(k3, (C, HID), dtype=jnp.float32) * 0.1
    b2 = jax.random.normal(k4, (C, 1), dtype=jnp.float32) * 0.01

    new = fsda_forward(x, w1, b1, w2, b2)
    jax.block_until_ready(new)

    # Reference check in plain JAX.
    pooled = jnp.mean(x.reshape(N, C, H * W), axis=-1)               # (N, C)
    h = jnp.maximum(pooled @ w1.T + b1[:, 0], 0.0)                   # (N, HID)
    imp_ref = jax.nn.sigmoid(h @ w2.T + b2[:, 0])                    # (N, C)
    new_ref = x * imp_ref[:, :, None, None]

    assert new.shape == (N, C, H, W)
    assert jnp.allclose(new, new_ref, atol=1e-5, rtol=1e-5)

    print("KERNEL_OK")
</pallas_src>

<mosaic_0001>
module attributes {stable_mosaic.version = 11 : i64} {
  func.func @_fsda_kernel(%arg0: i32, %arg1: memref<8x256xf32, #tpu.memory_space<vmem>>, %arg2: memref<64x8xf32, #tpu.memory_space<vmem>>, %arg3: memref<64x1xf32, #tpu.memory_space<vmem>>, %arg4: memref<8x64xf32, #tpu.memory_space<vmem>>, %arg5: memref<8x1xf32, #tpu.memory_space<vmem>>, %arg6: memref<8x256xf32, #tpu.memory_space<vmem>>) attributes {dimension_semantics = [#tpu.dimension_semantics<parallel>], iteration_bounds = array<i64: 1>, scalar_prefetch = 0 : i64, scratch_operands = 0 : i64, tpu.core_type = #tpu.core_type<tc>, window_params = [{transform_indices = @transform_0, window_bounds = array<i64: 8, 256>}, {pipeline_mode = #tpu.pipeline_mode<synchronous>, transform_indices = @transform_1, window_bounds = array<i64: 64, 8>}, {pipeline_mode = #tpu.pipeline_mode<synchronous>, transform_indices = @transform_2, window_bounds = array<i64: 64, 1>}, {pipeline_mode = #tpu.pipeline_mode<synchronous>, transform_indices = @transform_3, window_bounds = array<i64: 8, 64>}, {pipeline_mode = #tpu.pipeline_mode<synchronous>, transform_indices = @transform_4, window_bounds = array<i64: 8, 1>}, {transform_indices = @transform_5, window_bounds = array<i64: 8, 256>}]} {
    %c0 = arith.constant 0 : index
    %c0_0 = arith.constant 0 : index
    %0 = vector.load %arg1[%c0, %c0_0] : memref<8x256xf32, #tpu.memory_space<vmem>>, vector<8x256xf32>
    %cst = arith.constant dense<0.000000e+00> : vector<8xf32>
    %1 = vector.multi_reduction <add>, %0, %cst [1] : vector<8x256xf32> to vector<8xf32>
    %2 = vector.shape_cast %1 : vector<8xf32> to vector<8x1xf32>
    %cst_1 = arith.constant 2.560000e+02 : f32
    %3 = vector.broadcast %cst_1 : f32 to vector<8x1xf32>
    %4 = arith.divf %2, %3 : vector<8x1xf32>
    %c0_2 = arith.constant 0 : index
    %c0_3 = arith.constant 0 : index
    %5 = vector.load %arg2[%c0_2, %c0_3] : memref<64x8xf32, #tpu.memory_space<vmem>>, vector<64x8xf32>
    %cst_4 = arith.constant dense<0.000000e+00> : vector<64x1xf32>
    %6 = tpu.matmul %5, %4, %cst_4 {dimension_numbers = #tpu.dot_dimension_numbers<[1], [0], [0], [1], [0, 0, 1, 1], [], []>} : vector<64x8xf32>, vector<8x1xf32>, vector<64x1xf32> -> vector<64x1xf32>
    %c0_5 = arith.constant 0 : index
    %c0_6 = arith.constant 0 : index
    %7 = vector.load %arg3[%c0_5, %c0_6] : memref<64x1xf32, #tpu.memory_space<vmem>>, vector<64x1xf32>
    %8 = arith.addf %6, %7 : vector<64x1xf32>
    %cst_7 = arith.constant 0.000000e+00 : f32
    %9 = vector.broadcast %cst_7 : f32 to vector<64x1xf32>
    %10 = arith.maximumf %8, %9 : vector<64x1xf32>
    %c0_8 = arith.constant 0 : index
    %c0_9 = arith.constant 0 : index
    %11 = vector.load %arg4[%c0_8, %c0_9] : memref<8x64xf32, #tpu.memory_space<vmem>>, vector<8x64xf32>
    %cst_10 = arith.constant dense<0.000000e+00> : vector<8x1xf32>
    %12 = tpu.matmul %11, %10, %cst_10 {dimension_numbers = #tpu.dot_dimension_numbers<[1], [0], [0], [1], [0, 0, 1, 1], [], []>} : vector<8x64xf32>, vector<64x1xf32>, vector<8x1xf32> -> vector<8x1xf32>
    %c0_11 = arith.constant 0 : index
    %c0_12 = arith.constant 0 : index
    %13 = vector.load %arg5[%c0_11, %c0_12] : memref<8x1xf32, #tpu.memory_space<vmem>>, vector<8x1xf32>
    %14 = arith.addf %12, %13 : vector<8x1xf32>
    %15 = arith.negf %14 : vector<8x1xf32>
    %16 = math.exp %15 : vector<8x1xf32>
    %cst_13 = arith.constant 1.000000e+00 : f32
    %17 = vector.broadcast %cst_13 : f32 to vector<8x1xf32>
    %18 = arith.addf %17, %16 : vector<8x1xf32>
    %19 = arith.divf %17, %18 : vector<8x1xf32>
    %20 = vector.broadcast %19 : vector<8x1xf32> to vector<8x256xf32>
    %21 = arith.mulf %0, %20 : vector<8x256xf32>
    %c0_14 = arith.constant 0 : index
    %c0_15 = arith.constant 0 : index
    %22 = vector.load %arg6[%c0_14, %c0_15] : memref<8x256xf32, #tpu.memory_space<vmem>>, vector<8x256xf32>
    tpu.vector_store %arg6[%c0_14, %c0_15], %21 {strides = array<i32>} : memref<8x256xf32, #tpu.memory_space<vmem>>, vector<8x256xf32>,
    return
  }
  func.func @transform_0(%arg0: i32) -> (i32, i32) {
    %c0_i32 = arith.constant 0 : i32
    %c0_i32_0 = arith.constant 0 : i32
    return %arg0, %c0_i32 : i32, i32
  }
  func.func @transform_1(%arg0: i32) -> (i32, i32) {
    %c0_i32 = arith.constant 0 : i32
    %c0_i32_0 = arith.constant 0 : i32
    %c0_i32_1 = arith.constant 0 : i32
    return %c0_i32, %c0_i32_0 : i32, i32
  }
  func.func @transform_2(%arg0: i32) -> (i32, i32) {
    %c0_i32 = arith.constant 0 : i32
    %c0_i32_0 = arith.constant 0 : i32
    %c0_i32_1 = arith.constant 0 : i32
    return %c0_i32, %c0_i32_0 : i32, i32
  }
  func.func @transform_3(%arg0: i32) -> (i32, i32) {
    %c0_i32 = arith.constant 0 : i32
    %c0_i32_0 = arith.constant 0 : i32
    %c0_i32_1 = arith.constant 0 : i32
    return %c0_i32, %c0_i32_0 : i32, i32
  }
  func.func @transform_4(%arg0: i32) -> (i32, i32) {
    %c0_i32 = arith.constant 0 : i32
    %c0_i32_0 = arith.constant 0 : i32
    %c0_i32_1 = arith.constant 0 : i32
    return %c0_i32, %c0_i32_0 : i32, i32
  }
  func.func @transform_5(%arg0: i32) -> (i32, i32) {
    %c0_i32 = arith.constant 0 : i32
    %c0_i32_0 = arith.constant 0 : i32
    return %arg0, %c0_i32 : i32, i32
  }
}

</mosaic_0001>

<bundles_post_ra>
// kernel: tpu_custom_call.1
= control target key start
LH: loop header
LB: loop body
LE: loop exit
PB: predicated region body
PF: predicated region fallthrough
CT: control target
= control target key end

     0   :  { %s517_s0 = inlined_call_operand.vmem [shape: f32[8,256], index: 0, kind: input, shape index: {}]   ;;  %s518_s1 = inlined_call_operand.vmem [shape: f32[64,8], index: 1, kind: input, shape index: {}]   ;;  %s519_s2 = inlined_call_operand.vmem [shape: f32[64,1], index: 2, kind: input, shape index: {}]   ;;  %s520_s3 = inlined_call_operand.vmem [shape: f32[8,64], index: 3, kind: input, shape index: {}]   ;;  %s521_s4 = inlined_call_operand.vmem [shape: f32[8,1], index: 4, kind: input, shape index: {}]   ;;  %s522_s5 = inlined_call_operand.hbm [shape: f32[8,256], index: 5, kind: output, shape index: {}]  }
   0x1   :  { %v432_v0 = vld [vmem:[%s517_s0] sm:$0xff]  ;;  %v437_v1 = vld [vmem:[%s517_s0 + $0x8] sm:$0xff] }
   0x2   :  { %10 = vsyncpa [#allocation3], 0  ;;  %v23_v2 = vadd.f32 %v437_v1, %v432_v0  ;;  %v28_v3 = vld [vmem:[%s518_s1] sm:$0xff]  ;;  %vm44_vm0 = vcmask 64512   ;;  %v29_v6 = vld [vmem:[%s518_s1 + $0x8] sm:$0xff]  ;;  %v394_v13 = vmov 0.0|0.0  }
   0x3   :  { %317 = vmatprep.mubr.msk.f32.mxu0 %vm44_vm0, %v28_v3  ;;  %v30_v7 = vld [vmem:[%s518_s1 + $0x10] sm:$0xff]  ;;  %v31_v8 = vld [vmem:[%s518_s1 + $0x18] sm:$0xff]  ;;  %v32_v9 = vld [vmem:[%s518_s1 + $0x20] sm:$0xff]  ;;  %348 = vmatprep.subr.bf16.mxu1 %v394_v13  ;;  %vm395_vm1 = vmmov 0   ;;  %v396_v14 = vmov 0.0   ;;  %vm184_vm2 = vcmask 523264  }
   0x4   :  { %24 = vadd.xlane.f32.xlu0 %v23_v2  ;;  %v33_v10 = vld [vmem:[%s518_s1 + $0x28] sm:$0xff]  ;;  %v34_v11 = vld [vmem:[%s518_s1 + $0x30] sm:$0xff]  ;;  %v35_v12 = vld [vmem:[%s518_s1 + $0x38] sm:$0xff]  ;;  %345 = vmatprep.mubr.msk.f32.mxu1 %vm395_vm1, %v396_v14  ;;  %v397_v52 = vmov 0   ;;  %s398_s29 = smov [#allocation2]  }
   0x5   :  { %v37_v15 = vld [vmem:[%s519_s2 + $0x8] sm:$0xff]  ;;  %v36_v16 = vld [vmem:[%s519_s2] sm:$0xff]  ;;  %v39_v21 = vld [vmem:[%s519_s2 + $0x18] sm:$0xff]  ;;  %365 = vset.pattern.permute.xlu0 %v397_v52 }
   0x6   :  { %v38_v23 = vld [vmem:[%s519_s2 + $0x10] sm:$0xff]  ;;  %v41_v29 = vld [vmem:[%s519_s2 + $0x28] sm:$0xff]  ;;  %v40_v32 = vld [vmem:[%s519_s2 + $0x20] sm:$0xff] }
   0x7   :  { %v43_v39 = vld [vmem:[%s519_s2 + $0x38] sm:$0xff]  ;;  %v42_v41 = vld [vmem:[%s519_s2 + $0x30] sm:$0xff]  ;;  %v182_v51 = vld [vmem:[%s520_s3] sm:$0xff]  ;;  %s279_s3 = sshll.u32 %s398_s29, 4  ;;  %s280_s3 = int_to_ptr.vmem [resolvable:$true] %s279_s3 }
   0x8   :  { %v183_v53 = vld [vmem:[%s521_s4] sm:$0xff]  ;;  %s370_s4 = scalar_lea.vmem %s280_s3, 256  ;;  %p375_p1 = scmp.lt.s32.totalorder %s280_s3, %s280_s3 }
   0x9   :  { %p371_p0 = scmp.ne.s32.totalorder %s280_s3, %s370_s4  ;;  %p376_p2 = scmp.lt.s32.totalorder %s370_s4, %s370_s4 }
   0xb   :  { %p377_p3 = por %p376_p2, %p375_p1 }
   0xd   :  { %p378_p4 = pnand %p377_p3, %p371_p0 }
  0x91   :  { %v25_v4 = vpop.xlane.xlu0 %24 }
  0x92   :  { %v27_v5 = vmul.f32 0.00390625, %v25_v4 }
  0x94   :  { %315 = vmatprep.subr.mxu0 %v27_v5 }
  0x95   :  { %316 = vmatpush3.msra.mxu0 %v27_v5 }
  0x96   :  { %318 = vmatmul.mubr.msk.f32.vlgmr.msra.gmra.mrb[0].mxu0 %vm44_vm0, %v29_v6 }
  0x97   :  { %320 = vmatprep.mubr.msk.f32.mxu0 %vm44_vm0, %v30_v7 }
  0x9a   :  { %321 = vmatmul.mubr.msk.f32.gmra.mrb[2].mxu0 %vm44_vm0, %v31_v8 }
  0x9b   :  { %323 = vmatprep.mubr.msk.f32.mxu0 %vm44_vm0, %v32_v9 }
  0x9e   :  { %324 = vmatmul.mubr.msk.f32.gmra.mrb[4].mxu0 %vm44_vm0, %v33_v10 }
  0x9f   :  { %326 = vmatprep.mubr.msk.f32.mxu0 %vm44_vm0, %v34_v11 }
  0xa2   :  { %327 = vmatmul.mubr.msk.f32.gmra.mrb[6].mxu0 %vm44_vm0, %v35_v12 }
 0x169   :  { %v319_v17 = vpop.f32.mrb[0].mxu0 }
 0x16a   :  { %v141_v18 = vadd.f32 %v319_v17, %v37_v15  ;;  %v135_v19 = vpop.f32.mrb[1].mxu0 }
 0x16b   :  { %v136_v20 = vadd.f32 %v135_v19, %v36_v16 }
 0x16c   :  { %v175_v22 = vmax.f32 %v141_v18, 0.0 }
 0x16d   :  { %v174_v24 = vmax.f32 %v136_v20, 0.0  ;;  %v322_v25 = vpop.f32.mrb[2].mxu0 }
 0x16e   :  { %v151_v26 = vadd.f32 %v322_v25, %v39_v21  ;;  %v145_v27 = vpop.f32.mrb[3].mxu0 }
 0x16f   :  { %v146_v28 = vadd.f32 %v145_v27, %v38_v23  ;;  %v349_v30 = vpack.c.bf16 %v175_v22, %v174_v24 }
 0x170   :  { %v177_v31 = vmax.f32 %v151_v26, 0.0 }
 0x171   :  { %v176_v33 = vmax.f32 %v146_v28, 0.0  ;;  %v325_v34 = vpop.f32.mrb[4].mxu0  ;;  %350 = vmatpush3.bf16.msra.mxu1 %v349_v30 }
 0x172   :  { %v161_v35 = vadd.f32 %v325_v34, %v41_v29  ;;  %v155_v36 = vpop.f32.mrb[5].mxu0  ;;  %351 = vmatprep.subr.bf16.mxu1 %v394_v13 }
 0x173   :  { %v352_v37 = vpack.c.bf16 %v177_v31, %v176_v33  ;;  %v156_v38 = vadd.f32 %v155_v36, %v40_v32 }
 0x174   :  { %v179_v40 = vmax.f32 %v161_v35, 0.0 }
 0x175   :  { %v178_v42 = vmax.f32 %v156_v38, 0.0  ;;  %v328_v43 = vpop.f32.mrb[6].mxu0  ;;  %353 = vmatpush3.bf16.msra.mxu1 %v352_v37 }
 0x176   :  { %v171_v44 = vadd.f32 %v328_v43, %v43_v39  ;;  %v165_v45 = vpop.f32.mrb[7].mxu0  ;;  %354 = vmatprep.subr.bf16.mxu1 %v394_v13 }
 0x177   :  { %v355_v46 = vpack.c.bf16 %v179_v40, %v178_v42  ;;  %v166_v47 = vadd.f32 %v165_v45, %v42_v41 }
 0x178   :  { %v181_v48 = vmax.f32 %v171_v44, 0.0 }
 0x179   :  { %v180_v49 = vmax.f32 %v166_v47, 0.0  ;;  %356 = vmatpush3.bf16.msra.mxu1 %v355_v46 }
 0x17a   :  { %357 = vmatprep.subr.bf16.mxu1 %v394_v13 }
 0x17b   :  { %v358_v50 = vpack.c.bf16 %v181_v48, %v180_v49 }
 0x17d   :  { %359 = vmatpush3.bf16.msra.mxu1 %v358_v50 }
 0x180   :  { %346 = vmatmul.mubr.msk.f32.vlgmr.msra.gmra.mrb[0].mxu1 %vm184_vm2, %v182_v51 }
 0x253   :  { %v254_v54 = vpop.f32.mrb[0].mxu1 }
 0x254   :  { %v255_v55 = vadd.f32 %v254_v54, %v183_v53  ;;  %v347_v56 = vpop.f32.mrb[1].mxu1 }
 0x256   :  { %v296_v57 = vmul.f32 -1.442695, %v255_v55 }
 0x258   :  { %366 = vpow2.f32 %v296_v57 }
 0x262   :  { %v367_v58 = vpop.eup %366 }
 0x263   :  { %v261_v59 = vadd.f32 1.0, %v367_v58 }
 0x265   :  { %368 = vrcp.f32 %v261_v59 }
 0x26f   :  { %v369_v60 = vpop.eup %368 }
 0x270   :  { %266 = vperm.xlu0 %365, %v369_v60  }
 0x2ef   :  { %v267_v61 = vpop.permute.xlu0 %266 }
 0x2f0   :  { %v269_v62 = vmul.f32 %v267_v61, %v432_v0  ;;  %v270_v63 = vmul.f32 %v267_v61, %v437_v1 }
 0x2f2   :  { %271 = vst [vmem:[#allocation2] sm:$0xff] %v269_v62  ;;  %272 = vst [vmem:[#allocation2 + $0x8] sm:$0xff] %v270_v63 }
 0x2f3   :  { %381 = shalt.err (!%p378_p4)
}
 0x2f4   :  { %s382_s7 = scalar_lea.hbm %s522_s5, 256 }
 0x2f5   :  { %p383_p5 = scmp.ne.s32.totalorder %s522_s5, %s382_s7  ;;  %p386_p6 = scmp.lt.u32.totalorder %s382_s7, %s522_s5 }
 0x2f7   :  { %p388_p7 = pnand %p386_p6, %p383_p5 }
 0x2f9   :  { %391 = shalt.err (!%p388_p7)
}
 0x2fa   :  { %282 = dma.vmem_to_hbm [thread:$0]  %s280_s3, 256, %s522_s5, [#allocation3]  }
 0x2fb   :  { %392 = dma.done.wait [#allocation3], 256  }
 0x2fc   :  { %393 = vsyncadd [#allocation3], 4294967040 }
 0x2fd   :  { %286 = vsyncpa [#allocation3], 1 }

</bundles_post_ra>
